<compile_context>
chip_gen: v7x
topology: tpu7x:2x2x1
jax: 0.10.0
libtpu: 0.0.40
codegen_flags: <defaults>
</compile_context>

<pallas_src>
import math
import functools

import jax
import jax.numpy as jnp
from jax.experimental import pallas as pl
from jax.experimental.pallas import tpu as pltpu


_SQRT_2_OVER_PI = math.sqrt(2.0 / math.pi)


def _gelu_tanh_f32(h):
    # Matches torch.nn.GELU(approximate='tanh'); h is f32.
    h2 = h * h
    inner = _SQRT_2_OVER_PI * h * (1.0 + 0.044715 * h2)
    return 0.5 * h * (1.0 + jnp.tanh(inner))


def _round_up(n, m):
    return ((n + m - 1) // m) * m


def _vmem_capacity_bytes():
    try:
        cap = int(pltpu.get_tpu_info().vmem_capacity_bytes)
        if cap > 0:
            return cap
    except Exception:
        pass
    return 64 * 1024 * 1024  # conservative: v7x per-TensorCore VMEM


def _has_buffered_pipeline_mode():
    try:
        pl.BlockSpec((8, 128), lambda i: (0, 0), pipeline_mode=pl.Buffered(1))
        return True
    except Exception:
        return False


_HAS_BUFFERED = _has_buffered_pipeline_mode()


def _const_spec(shape):
    """BlockSpec for an operand that is resident (constant index_map).

    Single-buffered when the installed Pallas supports pipeline_mode: only one
    DMA ever happens for these, so a second buffer is pure VMEM waste.
    """
    idx = lambda *args: (0, 0)
    if _HAS_BUFFERED:
        return pl.BlockSpec(shape, idx, pipeline_mode=pl.Buffered(1))
    return pl.BlockSpec(shape, idx)


def _choose_tile(M, tm):
    """Pick (row_tile, padded_M). Prefer a tile that divides M (no pad copy)
    and a grid of length >= 2 (v7x has two TensorCores)."""
    tm = max(16, _round_up(tm, 16))
    if M % 16 == 0:
        best_single = None
        for cand in range(min(tm, M), 15, -16):
            if M % cand != 0:
                continue
            if M // cand >= 2:
                return cand, M
            if best_single is None:
                best_single = cand
        if best_single is not None:
            return best_single, M
    tile = min(tm, _round_up(M, 16))
    m_pad = _round_up(M, tile)
    if m_pad // tile < 2 and M > 16:
        tile = max(16, _round_up((M + 1) // 2, 16))
        m_pad = _round_up(M, tile)
    return tile, m_pad


def _choose_h_tile(H, C, tile, wbytes, xbytes, budget):
    """Largest divisor of H (multiple of 128) whose streamed footprint fits."""
    best = None
    for th in range(128, H + 1, 128):
        if H % th:
            continue
        foot = (2 * 2 * C * th * wbytes      # double-buffered c_fc + c_proj slices
                + 4 * tile * C * xbytes      # double-buffered x / out row tiles
                + tile * C * 4               # f32 accumulator scratch
                + 2 * tile * th * 4)         # f32 hidden temporaries
        if foot <= budget:
            best = th
    return best


def mlp_kernel_fused(x_ref, w_fc_ref, b_fc_ref, w_proj_ref, b_proj_ref, o_ref):
    # x_ref:(tm,C)  w_fc:(C,4C)  b_fc:(1,4C)  w_proj:(4C,C)  b_proj:(1,C)
    # MXU consumes operands in their stored dtype; f32 accumulation forced.
    h = jnp.dot(x_ref[...], w_fc_ref[...], preferred_element_type=jnp.float32)
    h = h + b_fc_ref[...].astype(jnp.float32)
    h = _gelu_tanh_f32(h)
    h = h.astype(w_proj_ref.dtype)     # full MXU rate when params are bf16
    y = jnp.dot(h, w_proj_ref[...], preferred_element_type=jnp.float32)
    y = y + b_proj_ref[...].astype(jnp.float32)
    o_ref[...] = y.astype(o_ref.dtype)


def mlp_kernel_htiled(x_ref, w_fc_ref, b_fc_ref, w_proj_ref, b_proj_ref,
                      o_ref, acc_ref):
    # Streams H in slices: x:(tm,C)  w_fc:(C,th)  b_fc:(1,th)  w_proj:(th,C)
    # b_proj:(1,C) resident.  acc_ref:(tm,C) f32 scratch, resident across h.
    h_idx = pl.program_id(1)

    @pl.when(h_idx == 0)
    def _():
        acc_ref[...] = jnp.zeros_like(acc_ref)

    h = jnp.dot(x_ref[...], w_fc_ref[...], preferred_element_type=jnp.float32)
    h = h + b_fc_ref[...].astype(jnp.float32)
    h = _gelu_tanh_f32(h)
    h = h.astype(w_proj_ref.dtype)
    acc_ref[...] += jnp.dot(h, w_proj_ref[...],
                            preferred_element_type=jnp.float32)

    @pl.when(h_idx == pl.num_programs(1) - 1)
    def _():
        y = acc_ref[...] + b_proj_ref[...].astype(jnp.float32)
        o_ref[...] = y.astype(o_ref.dtype)


@functools.partial(jax.jit, static_argnames=("tm", "h_tile"))
def mlp_forward(x, w_fc, b_fc, w_proj, b_proj, *, tm=256, h_tile=None):
    """GPT-2 MLP forward. x: (B, T, C) -> (B, T, C).

    w_fc: (C, 4C), w_proj: (4C, C) (transposed vs torch.nn.Linear storage).
    Pass bf16 params/activations for full MXU rate; accumulation is f32.
    On v6e (128 MiB VMEM) tm=512 is slightly faster for GPT-2-class shapes.
    """
    B, T, C = x.shape
    H = w_fc.shape[1]          # 4*C
    M = B * T

    b_fc = b_fc.reshape(1, H)
    b_proj = b_proj.reshape(1, C)

    tile, m_pad = _choose_tile(M, tm)
    n_row_tiles = m_pad // tile

    x2 = x.reshape(M, C)
    if m_pad != M:
        x2 = jnp.pad(x2, ((0, m_pad - M), (0, 0)))

    # ---- VMEM sizing (trace-time Python ints) ------------------------------
    cap = int(0.8 * _vmem_capacity_bytes())
    resident_factor = 1 if _HAS_BUFFERED else 2
    wbytes = jnp.dtype(w_fc.dtype).itemsize
    pbytes = jnp.dtype(w_proj.dtype).itemsize
    xbytes = jnp.dtype(x.dtype).itemsize

    act_bytes = 2 * 2 * tile * C * xbytes         # double-buffered x & out tiles
    fused_resident = (C * H * wbytes + H * C * pbytes
                      + H * wbytes + C * pbytes) * resident_factor
    fused_inter = 2 * tile * H * 4                # f32 hidden temporaries
    fused_total = fused_resident + act_bytes + fused_inter

    use_h = (h_tile is not None) or (H % 128 == 0 and
                                     fused_total > int(0.7 * cap))

    if use_h:
        if h_tile is not None:
            th = int(h_tile)
            assert H % th == 0 and th % 128 == 0, \
                "h_tile must divide 4*n_embd and be a multiple of 128"
        else:
            th = _choose_h_tile(H, C, tile, max(wbytes, pbytes), xbytes,
                                int(0.7 * cap))
            if th is None:
                th = 128
        htot = (2 * (C * th * wbytes + th * C * pbytes)   # streamed weight slices
                + 2 * 2 * th * wbytes + C * pbytes        # b_fc slices + b_proj
                + act_bytes + tile * C * 4 + 2 * tile * th * 4)
        vmem_limit = min(cap, max(min(32 << 20, cap), int(1.25 * htot)))
    else:
        th = H
        vmem_limit = min(cap, max(min(32 << 20, cap), int(1.25 * fused_total)))

    weight_stream = n_row_tiles if use_h else 1
    cost = pl.CostEstimate(
        flops=4 * m_pad * C * H,                 # two (M,C)x(C,H)-class matmuls
        transcendentals=m_pad * H,               # one tanh per hidden element
        bytes_accessed=(m_pad * C * xbytes * 2
                        + (C * H * wbytes + H * C * pbytes) * weight_stream
                        + H * wbytes + C * pbytes),
    )

    if use_h:
        out2 = pl.pallas_call(
            mlp_kernel_htiled,
            out_shape=jax.ShapeDtypeStruct((m_pad, C), x.dtype),
            grid_spec=pltpu.PrefetchScalarGridSpec(
                num_scalar_prefetch=0,
                grid=(n_row_tiles, H // th),
                in_specs=[
                    pl.BlockSpec((tile, C), lambda i, h: (i, 0)),   # x row tile
                    pl.BlockSpec((C, th), lambda i, h: (0, h)),     # w_fc slice
                    pl.BlockSpec((1, th), lambda i, h: (0, h)),     # b_fc slice
                    pl.BlockSpec((th, C), lambda i, h: (h, 0)),     # w_proj slice
                    _const_spec((1, C)),                            # b_proj
                ],
                out_specs=pl.BlockSpec((tile, C), lambda i, h: (i, 0)),
                scratch_shapes=[pltpu.VMEM((tile, C), jnp.float32)],
            ),
            compiler_params=pltpu.CompilerParams(
                dimension_semantics=("parallel", "arbitrary"),
                vmem_limit_bytes=vmem_limit,
            ),
            cost_estimate=cost,
        )(x2, w_fc, b_fc, w_proj, b_proj)
    else:
        out2 = pl.pallas_call(
            mlp_kernel_fused,
            out_shape=jax.ShapeDtypeStruct((m_pad, C), x.dtype),
            grid_spec=pltpu.PrefetchScalarGridSpec(
                num_scalar_prefetch=0,
                grid=(n_row_tiles,),
                in_specs=[
                    pl.BlockSpec((tile, C), lambda i: (i, 0)),  # x row tile
                    _const_spec((C, H)),                        # w_fc (resident)
                    _const_spec((1, H)),                        # b_fc
                    _const_spec((H, C)),                        # w_proj (resident)
                    _const_spec((1, C)),                        # b_proj
                ],
                out_specs=pl.BlockSpec((tile, C), lambda i: (i, 0)),
            ),
            compiler_params=pltpu.CompilerParams(
                dimension_semantics=("parallel",),
                vmem_limit_bytes=vmem_limit,
            ),
            cost_estimate=cost,
        )(x2, w_fc, b_fc, w_proj, b_proj)

    if m_pad != M:
        out2 = out2[:M]
    return out2.reshape(B, T, C)


def init_mlp_params(key, n_embd, dtype=jnp.float32):
    # GPT-2-style init (normal, std=0.02; c_proj scaled down). Non-zero biases
    # so the bias path is exercised.
    k1, k2, k3, k4 = jax.random.split(key, 4)
    hidden = 4 * n_embd
    w_fc = (0.02 * jax.random.normal(k1, (n_embd, hidden))).astype(dtype)
    b_fc = (0.02 * jax.random.normal(k3, (1, hidden))).astype(dtype)
    w_proj = (0.02 / math.sqrt(2.0) *
              jax.random.normal(k2, (hidden, n_embd))).astype(dtype)
    b_proj = (0.02 * jax.random.normal(k4, (1, n_embd))).astype(dtype)
    return w_fc, b_fc, w_proj, b_proj


if __name__ == "__main__":
    key = jax.random.PRNGKey(0)
    kx, kp = jax.random.split(key)

    # Small GPT-2-like config; C=128 keeps output stores lane-dense.
    B, T, n_embd = 2, 8, 128
    x = jax.random.normal(kx, (B, T, n_embd), jnp.float32)
    w_fc, b_fc, w_proj, b_proj = init_mlp_params(kp, n_embd)

    # Plain-JAX reference (same math as the torch module).
    h_ref = x.reshape(-1, n_embd) @ w_fc + b_fc
    h_ref = _gelu_tanh_f32(h_ref)
    ref = (h_ref @ w_proj + b_proj).reshape(B, T, n_embd)

    # 1) Fused resident-weight path (f32 params).
    out = jax.block_until_ready(mlp_forward(x, w_fc, b_fc, w_proj, b_proj))
    assert jnp.allclose(out, ref, atol=1e-4, rtol=1e-4), "f32 fused mismatch"

    # 2) H-tiled accumulator path (the large-C / v7x fallback), forced here so
    #    both code paths compile and run.
    out_h = jax.block_until_ready(
        mlp_forward(x, w_fc, b_fc, w_proj, b_proj, h_tile=128))
    assert jnp.allclose(out_h, ref, atol=1e-4, rtol=1e-4), "f32 H-tiled mismatch"

    # 3) bf16 params/activations (native-dtype MXU operands, f32 accumulation).
    xb = x.astype(jnp.bfloat16)
    wfb, bfb, wpb, bpb = (a.astype(jnp.bfloat16)
                          for a in (w_fc, b_fc, w_proj, b_proj))
    out_bf16 = jax.block_until_ready(mlp_forward(xb, wfb, bfb, wpb, bpb))
    assert jnp.allclose(out_bf16.astype(jnp.float32), ref,
                        atol=5e-2, rtol=5e-2), "bf16 mismatch"

    print("KERNEL_OK")
</pallas_src>

<mosaic_0001>
module attributes {stable_mosaic.version = 11 : i64} {
  func.func @mlp_kernel_fused(%arg0: i32, %arg1: memref<16x128xf32, #tpu.memory_space<vmem>>, %arg2: memref<128x512xf32, #tpu.memory_space<vmem>>, %arg3: memref<1x512xf32, #tpu.memory_space<vmem>>, %arg4: memref<512x128xf32, #tpu.memory_space<vmem>>, %arg5: memref<1x128xf32, #tpu.memory_space<vmem>>, %arg6: memref<16x128xf32, #tpu.memory_space<vmem>>) attributes {dimension_semantics = [#tpu.dimension_semantics<parallel>], iteration_bounds = array<i64: 1>, scalar_prefetch = 0 : i64, scratch_operands = 0 : i64, tpu.core_type = #tpu.core_type<tc>, window_params = [{transform_indices = @transform_0, window_bounds = array<i64: 16, 128>}, {pipeline_mode = #tpu.pipeline_mode<synchronous>, transform_indices = @transform_1, window_bounds = array<i64: 128, 512>}, {pipeline_mode = #tpu.pipeline_mode<synchronous>, transform_indices = @transform_2, window_bounds = array<i64: 1, 512>}, {pipeline_mode = #tpu.pipeline_mode<synchronous>, transform_indices = @transform_3, window_bounds = array<i64: 512, 128>}, {pipeline_mode = #tpu.pipeline_mode<synchronous>, transform_indices = @transform_4, window_bounds = array<i64: 1, 128>}, {transform_indices = @transform_5, window_bounds = array<i64: 16, 128>}]} {
    %c0 = arith.constant 0 : index
    %c0_0 = arith.constant 0 : index
    %0 = vector.load %arg1[%c0, %c0_0] : memref<16x128xf32, #tpu.memory_space<vmem>>, vector<16x128xf32>
    %c0_1 = arith.constant 0 : index
    %c0_2 = arith.constant 0 : index
    %1 = vector.load %arg2[%c0_1, %c0_2] : memref<128x512xf32, #tpu.memory_space<vmem>>, vector<128x512xf32>
    %cst = arith.constant dense<0.000000e+00> : vector<16x512xf32>
    %2 = tpu.matmul %0, %1, %cst {dimension_numbers = #tpu.dot_dimension_numbers<[1], [0], [0], [1], [0, 0, 1, 1], [], []>} : vector<16x128xf32>, vector<128x512xf32>, vector<16x512xf32> -> vector<16x512xf32>
    %c0_3 = arith.constant 0 : index
    %c0_4 = arith.constant 0 : index
    %3 = vector.load %arg3[%c0_3, %c0_4] : memref<1x512xf32, #tpu.memory_space<vmem>>, vector<1x512xf32>
    %4 = vector.broadcast %3 : vector<1x512xf32> to vector<16x512xf32>
    %5 = arith.addf %2, %4 : vector<16x512xf32>
    %6 = arith.mulf %5, %5 : vector<16x512xf32>
    %cst_5 = arith.constant 0.797884583 : f32
    %7 = vector.broadcast %cst_5 : f32 to vector<16x512xf32>
    %8 = arith.mulf %7, %5 : vector<16x512xf32>
    %cst_6 = arith.constant 4.471500e-02 : f32
    %9 = vector.broadcast %cst_6 : f32 to vector<16x512xf32>
    %10 = arith.mulf %9, %6 : vector<16x512xf32>
    %cst_7 = arith.constant 1.000000e+00 : f32
    %11 = vector.broadcast %cst_7 : f32 to vector<16x512xf32>
    %12 = arith.addf %11, %10 : vector<16x512xf32>
    %13 = arith.mulf %8, %12 : vector<16x512xf32>
    %cst_8 = arith.constant 5.000000e-01 : f32
    %14 = vector.broadcast %cst_8 : f32 to vector<16x512xf32>
    %15 = arith.mulf %14, %5 : vector<16x512xf32>
    %16 = math.tanh %13 : vector<16x512xf32>
    %cst_9 = arith.constant 1.000000e+00 : f32
    %17 = vector.broadcast %cst_9 : f32 to vector<16x512xf32>
    %18 = arith.addf %17, %16 : vector<16x512xf32>
    %19 = arith.mulf %15, %18 : vector<16x512xf32>
    %c0_10 = arith.constant 0 : index
    %c0_11 = arith.constant 0 : index
    %20 = vector.load %arg4[%c0_10, %c0_11] : memref<512x128xf32, #tpu.memory_space<vmem>>, vector<512x128xf32>
    %cst_12 = arith.constant dense<0.000000e+00> : vector<16x128xf32>
    %21 = tpu.matmul %19, %20, %cst_12 {dimension_numbers = #tpu.dot_dimension_numbers<[1], [0], [0], [1], [0, 0, 1, 1], [], []>} : vector<16x512xf32>, vector<512x128xf32>, vector<16x128xf32> -> vector<16x128xf32>
    %c0_13 = arith.constant 0 : index
    %c0_14 = arith.constant 0 : index
    %22 = vector.load %arg5[%c0_13, %c0_14] : memref<1x128xf32, #tpu.memory_space<vmem>>, vector<1x128xf32>
    %23 = vector.broadcast %22 : vector<1x128xf32> to vector<16x128xf32>
    %24 = arith.addf %21, %23 : vector<16x128xf32>
    %c0_15 = arith.constant 0 : index
    %c0_16 = arith.constant 0 : index
    %25 = vector.load %arg6[%c0_15, %c0_16] : memref<16x128xf32, #tpu.memory_space<vmem>>, vector<16x128xf32>
    tpu.vector_store %arg6[%c0_15, %c0_16], %24 {strides = array<i32>} : memref<16x128xf32, #tpu.memory_space<vmem>>, vector<16x128xf32>,
    return
  }
  func.func @transform_0(%arg0: i32) -> (i32, i32) {
    %c0_i32 = arith.constant 0 : i32
    %c0_i32_0 = arith.constant 0 : i32
    return %arg0, %c0_i32 : i32, i32
  }
  func.func @transform_1(%arg0: i32) -> (i32, i32) {
    %c0_i32 = arith.constant 0 : i32
    %c0_i32_0 = arith.constant 0 : i32
    %c0_i32_1 = arith.constant 0 : i32
    return %c0_i32, %c0_i32_0 : i32, i32
  }
  func.func @transform_2(%arg0: i32) -> (i32, i32) {
    %c0_i32 = arith.constant 0 : i32
    %c0_i32_0 = arith.constant 0 : i32
    %c0_i32_1 = arith.constant 0 : i32
    return %c0_i32, %c0_i32_0 : i32, i32
  }
  func.func @transform_3(%arg0: i32) -> (i32, i32) {
    %c0_i32 = arith.constant 0 : i32
    %c0_i32_0 = arith.constant 0 : i32
    %c0_i32_1 = arith.constant 0 : i32
    return %c0_i32, %c0_i32_0 : i32, i32
  }
  func.func @transform_4(%arg0: i32) -> (i32, i32) {
    %c0_i32 = arith.constant 0 : i32
    %c0_i32_0 = arith.constant 0 : i32
    %c0_i32_1 = arith.constant 0 : i32
    return %c0_i32, %c0_i32_0 : i32, i32
  }
  func.func @transform_5(%arg0: i32) -> (i32, i32) {
    %c0_i32 = arith.constant 0 : i32
    %c0_i32_0 = arith.constant 0 : i32
    return %arg0, %c0_i32 : i32, i32
  }
}

</mosaic_0001>

<bundles_post_ra>
// kernel: mlp_forward.1
= control target key start
LH: loop header
LB: loop body
LE: loop exit
PB: predicated region body
PF: predicated region fallthrough
CT: control target
= control target key end

     0   :  { %10 = vsyncpa [#allocation3], 0  ;;  %s1083_s0 = inlined_call_operand.hbm [shape: f32[16,128], index: 0, kind: input, shape index: {}]   ;;  %s1084_s1 = inlined_call_operand.hbm [shape: f32[128,512], index: 1, kind: input, shape index: {}]   ;;  %s1085_s2 = inlined_call_operand.vmem [shape: f32[1,512], index: 2, kind: input, shape index: {}]   ;;  %s1086_s3 = inlined_call_operand.hbm [shape: f32[512,128], index: 3, kind: input, shape index: {}]   ;;  %s1087_s4 = inlined_call_operand.vmem [shape: f32[1,128], index: 4, kind: input, shape index: {}]   ;;  %s1088_s5 = inlined_call_operand.hbm [shape: f32[16,128], index: 5, kind: output, shape index: {}]  }
   0x1   :  { %11 = vsyncpa [#allocation6], 0 }
   0x2   :  { %12 = vsyncpa [#allocation4], 0  ;;  %s941_s18 = smov [#allocation5]   ;;  %s847_s22 = scalar_lea.hbm %s1084_s1, 8192 }
   0x3   :  { %s30_s19 = sshll.u32 %s941_s18, 4  ;;  %p848_p0 = scmp.ne.s32.totalorder %s1084_s1, %s847_s22  ;;  %s31_s19 = int_to_ptr.vmem [resolvable:$true] %s30_s19 }
   0x4   :  { %p851_p1 = scmp.lt.u32.totalorder %s847_s22, %s1084_s1 }
   0x6   :  { %p853_p2 = pnand %p851_p1, %p848_p0 }
   0x8   :  { %856 = shalt.err (!%p853_p2)
}
   0x9   :  { %s857_s27 = scalar_lea.vmem %s31_s19, 8192  ;;  %p862_p4 = scmp.lt.s32.totalorder %s31_s19, %s31_s19 }
   0xa   :  { %p858_p3 = scmp.ne.s32.totalorder %s31_s19, %s857_s27  ;;  %p863_p5 = scmp.lt.s32.totalorder %s857_s27, %s857_s27 }
   0xc   :  { %p864_p6 = por %p863_p5, %p862_p4 }
   0xe   :  { %p865_p7 = pnand %p864_p6, %p858_p3 }
  0x10   :  { %868 = shalt.err (!%p865_p7)
}
  0x11   :  { %s942_s28 = smov 512   ;;  %s943_s29 = smov 32  }
  0x12   :  { %36 = dma.hbm_to_vmem [thread:$0]  %s1084_s1, 8192, %s31_s19, [#allocation6], %s942_s28, %s942_s28, %s943_s29  }
  0x13   :  { %s944_s7 = smov [#allocation2]   ;;  %s869_s11 = scalar_lea.hbm %s1083_s0, 256 }
  0x14   :  { %s18_s8 = sshll.u32 %s944_s7, 4  ;;  %p870_p8 = scmp.ne.s32.totalorder %s1083_s0, %s869_s11  ;;  %s19_s8 = int_to_ptr.vmem [resolvable:$true] %s18_s8 }
  0x15   :  { %p873_p9 = scmp.lt.u32.totalorder %s869_s11, %s1083_s0 }
  0x17   :  { %p875_p10 = pnand %p873_p9, %p870_p8 }
  0x19   :  { %878 = shalt.err (!%p875_p10)
}
  0x1a   :  { %s879_s16 = scalar_lea.vmem %s19_s8, 256  ;;  %p884_p12 = scmp.lt.s32.totalorder %s19_s8, %s19_s8 }
  0x1b   :  { %p880_p11 = scmp.ne.s32.totalorder %s19_s8, %s879_s16  ;;  %p885_p13 = scmp.lt.s32.totalorder %s879_s16, %s879_s16 }
  0x1d   :  { %p886_p0 = por %p885_p13, %p884_p12 }
  0x1f   :  { %p887_p1 = pnand %p886_p0, %p880_p11 }
  0x21   :  { %890 = shalt.err (!%p887_p1)
}
  0x22   :  { %s945_s1 = smov 128   ;;  %s946_s17 = smov 8  }
  0x23   :  { %24 = dma.hbm_to_vmem [thread:$0]  %s1083_s0, 256, %s19_s8, [#allocation3], %s945_s1, %s945_s1, %s946_s17  }
  0x24   :  { %s947_s20 = smov [#allocation7]   ;;  %s891_s24 = scalar_lea.hbm %s1086_s3, 8192 }
  0x25   :  { %s44_s21 = sshll.u32 %s947_s20, 4  ;;  %p892_p2 = scmp.ne.s32.totalorder %s1086_s3, %s891_s24  ;;  %s45_s21 = int_to_ptr.vmem [resolvable:$true] %s44_s21 }
  0x26   :  { %p895_p3 = scmp.lt.u32.totalorder %s891_s24, %s1086_s3 }
  0x28   :  { %p897_p4 = pnand %p895_p3, %p892_p2 }
  0x2a   :  { %900 = shalt.err (!%p897_p4)
}
  0x2b   :  { %s901_s29 = scalar_lea.vmem %s45_s21, 8192  ;;  %p906_p6 = scmp.lt.s32.totalorder %s45_s21, %s45_s21 }
  0x2c   :  { %p902_p5 = scmp.ne.s32.totalorder %s45_s21, %s901_s29  ;;  %p907_p7 = scmp.lt.s32.totalorder %s901_s29, %s901_s29 }
  0x2e   :  { %p908_p8 = por %p907_p7, %p906_p6 }
  0x30   :  { %p909_p9 = pnand %p908_p8, %p902_p5 }
  0x32   :  { %912 = shalt.err (!%p909_p9)
}
  0x33   :  { %50 = dma.hbm_to_vmem [thread:$0]  %s1086_s3, 8192, %s45_s21, [#allocation6], %s945_s1, %s945_s1, %s946_s17  }
  0x34   :  { %935 = dma.done.wait [#allocation3], 256  }
  0x35   :  { %936 = vsyncadd [#allocation3], 4294967040 }
  0x36   :  { %937 = dma.done.wait [#allocation6], 16384  }
  0x37   :  { %938 = vsyncadd [#allocation6], 4294950912  ;;  %v948_v0 = vmov 0.0   ;;  %v65_v1 = vld [vmem:[#allocation5 + $0x8] sm:$0xff]  ;;  %v67_v3 = vld [vmem:[#allocation5 + $0x18] sm:$0xff]  ;;  %s949_s8 = smov [#allocation8]  }
  0x38   :  { %214 = vmatprep.mubr.f32.mxu0 %v948_v0  ;;  %291 = vmatprep.mubr.f32.mxu1 %v948_v0  ;;  %v69_v2 = vld [vmem:[#allocation5 + $0x28] sm:$0xff]  ;;  %v71_v5 = vld [vmem:[#allocation5 + $0x38] sm:$0xff]  ;;  %v64_v6 = vld [vmem:[#allocation5] sm:$0xff]  ;;  %s604_s9 = sshll.u32 %s949_s8, 4  ;;  %s605_s9 = int_to_ptr.vmem [resolvable:$true] %s604_s9 }
  0x39   :  { %v694_v4 = vpack.c.bf16 %v69_v2, %v65_v1  ;;  %v68_v7 = vld [vmem:[#allocation5 + $0x20] sm:$0xff]  ;;  %v726_v8 = vpack.c.bf16 %v71_v5, %v67_v3  ;;  %v66_v10 = vld [vmem:[#allocation5 + $0x10] sm:$0xff]  ;;  %v73_v12 = vld [vmem:[#allocation5 + $0x48] sm:$0xff]  ;;  %p918_p11 = scmp.lt.s32.totalorder %s605_s9, %s605_s9 }
  0x3a   :  { %v696_v9 = vpack.c.bf16 %v68_v7, %v64_v6  ;;  %v70_v11 = vld [vmem:[#allocation5 + $0x30] sm:$0xff]  ;;  %v77_v14 = vld [vmem:[#allocation5 + $0x68] sm:$0xff]  ;;  %v75_v15 = vld [vmem:[#allocation5 + $0x58] sm:$0xff] }
  0x3b   :  { %695 = vmatprep.subr.bf16.mxu0 %v694_v4  ;;  %v728_v13 = vpack.c.bf16 %v70_v11, %v66_v10  ;;  %v79_v16 = vld [vmem:[#allocation5 + $0x78] sm:$0xff]  ;;  %727 = vmatprep.subr.bf16.mxu1 %v726_v8  ;;  %v698_v17 = vpack.c.bf16 %v77_v14, %v73_v12  ;;  %v72_v19 = vld [vmem:[#allocation5 + $0x40] sm:$0xff]  ;;  %v74_v21 = vld [vmem:[#allocation5 + $0x50] sm:$0xff] }
  0x3c   :  { %697 = vmatpush1.bf16.msra.mxu0 %v696_v9  ;;  %v730_v18 = vpack.c.bf16 %v79_v16, %v75_v15  ;;  %v76_v20 = vld [vmem:[#allocation5 + $0x60] sm:$0xff]  ;;  %v78_v23 = vld [vmem:[#allocation5 + $0x70] sm:$0xff]  ;;  %v81_v24 = vld [vmem:[#allocation5 + $0x88] sm:$0xff] }
  0x3d   :  { %729 = vmatpush1.bf16.msra.mxu1 %v728_v13  ;;  %v700_v22 = vpack.c.bf16 %v76_v20, %v72_v19  ;;  %v85_v25 = vld [vmem:[#allocation5 + $0xa8] sm:$0xff]  ;;  %699 = vmatprep.subr.bf16.mxu0 %v698_v17  ;;  %v732_v26 = vpack.c.bf16 %v78_v23, %v74_v21  ;;  %v83_v28 = vld [vmem:[#allocation5 + $0x98] sm:$0xff]  ;;  %v80_v30 = vld [vmem:[#allocation5 + $0x80] sm:$0xff] }
  0x3e   :  { %731 = vmatprep.subr.bf16.mxu1 %v730_v18  ;;  %v702_v27 = vpack.c.bf16 %v85_v25, %v81_v24  ;;  %v87_v29 = vld [vmem:[#allocation5 + $0xb8] sm:$0xff]  ;;  %v84_v32 = vld [vmem:[#allocation5 + $0xa0] sm:$0xff]  ;;  %v82_v33 = vld [vmem:[#allocation5 + $0x90] sm:$0xff] }
  0x3f   :  { %v734_v31 = vpack.c.bf16 %v87_v29, %v83_v28  ;;  %v86_v34 = vld [vmem:[#allocation5 + $0xb0] sm:$0xff]  ;;  %v704_v35 = vpack.c.bf16 %v84_v32, %v80_v30  ;;  %v89_v36 = vld [vmem:[#allocation5 + $0xc8] sm:$0xff]  ;;  %v91_v38 = vld [vmem:[#allocation5 + $0xd8] sm:$0xff] }
  0x40   :  { %701 = vmatpush1.bf16.msra.mxu0 %v700_v22  ;;  %v93_v37 = vld [vmem:[#allocation5 + $0xe8] sm:$0xff]  ;;  %v736_v39 = vpack.c.bf16 %v86_v34, %v82_v33  ;;  %v95_v41 = vld [vmem:[#allocation5 + $0xf8] sm:$0xff]  ;;  %v88_v42 = vld [vmem:[#allocation5 + $0xc0] sm:$0xff] }
  0x41   :  { %733 = vmatpush1.bf16.msra.mxu1 %v732_v26  ;;  %703 = vmatprep.subr.bf16.mxu0 %v702_v27  ;;  %v706_v40 = vpack.c.bf16 %v93_v37, %v89_v36  ;;  %v92_v43 = vld [vmem:[#allocation5 + $0xe0] sm:$0xff]  ;;  %v738_v44 = vpack.c.bf16 %v95_v41, %v91_v38  ;;  %v90_v45 = vld [vmem:[#allocation5 + $0xd0] sm:$0xff]  ;;  %v97_v47 = vld [vmem:[#allocation5 + $0x108] sm:$0xff] }
  0x42   :  { %735 = vmatprep.subr.bf16.mxu1 %v734_v31  ;;  %v94_v46 = vld [vmem:[#allocation5 + $0xf0] sm:$0xff]  ;;  %v101_v48 = vld [vmem:[#allocation5 + $0x128] sm:$0xff]  ;;  %v99_v49 = vld [vmem:[#allocation5 + $0x118] sm:$0xff]  ;;  %v708_v51 = vpack.c.bf16 %v92_v43, %v88_v42 }
  0x43   :  { %v103_v50 = vld [vmem:[#allocation5 + $0x138] sm:$0xff]  ;;  %v740_v52 = vpack.c.bf16 %v94_v46, %v90_v45  ;;  %v710_v53 = vpack.c.bf16 %v101_v48, %v97_v47  ;;  %v96_v54 = vld [vmem:[#allocation5 + $0x100] sm:$0xff]  ;;  %v98_v56 = vld [vmem:[#allocation5 + $0x110] sm:$0xff] }
  0x44   :  { %705 = vmatpush1.bf16.msra.mxu0 %v704_v35  ;;  %v100_v55 = vld [vmem:[#allocation5 + $0x120] sm:$0xff]  ;;  %v742_v57 = vpack.c.bf16 %v103_v50, %v99_v49  ;;  %v102_v58 = vld [vmem:[#allocation5 + $0x130] sm:$0xff]  ;;  %v105_v59 = vld [vmem:[#allocation5 + $0x148] sm:$0xff] }
  0x45   :  { %737 = vmatpush1.bf16.msra.mxu1 %v736_v39  ;;  %707 = vmatprep.subr.bf16.mxu0 %v706_v40  ;;  %v109_v60 = vld [vmem:[#allocation5 + $0x168] sm:$0xff]  ;;  %v107_v61 = vld [vmem:[#allocation5 + $0x158] sm:$0xff]  ;;  %v712_v63 = vpack.c.bf16 %v100_v55, %v96_v54  ;;  %v744_v1 = vpack.c.bf16 %v102_v58, %v98_v56  ;;  %v104_v3 = vld [vmem:[#allocation5 + $0x140] sm:$0xff] }
  0x46   :  { %739 = vmatprep.subr.bf16.mxu1 %v738_v44  ;;  %v111_v62 = vld [vmem:[#allocation5 + $0x178] sm:$0xff]  ;;  %v714_v2 = vpack.c.bf16 %v109_v60, %v105_v59  ;;  %v108_v4 = vld [vmem:[#allocation5 + $0x160] sm:$0xff]  ;;  %v106_v5 = vld [vmem:[#allocation5 + $0x150] sm:$0xff] }
  0x47   :  { %v746_v6 = vpack.c.bf16 %v111_v62, %v107_v61  ;;  %v110_v7 = vld [vmem:[#allocation5 + $0x170] sm:$0xff]  ;;  %v113_v8 = vld [vmem:[#allocation5 + $0x188] sm:$0xff]  ;;  %v115_v10 = vld [vmem:[#allocation5 + $0x198] sm:$0xff]  ;;  %v716_v12 = vpack.c.bf16 %v108_v4, %v104_v3 }
  0x48   :  { %709 = vmatpush1.bf16.msra.mxu0 %v708_v51  ;;  %v117_v9 = vld [vmem:[#allocation5 + $0x1a8] sm:$0xff]  ;;  %v119_v11 = vld [vmem:[#allocation5 + $0x1b8] sm:$0xff]  ;;  %v748_v13 = vpack.c.bf16 %v110_v7, %v106_v5  ;;  %v112_v15 = vld [vmem:[#allocation5 + $0x180] sm:$0xff] }
  0x49   :  { %741 = vmatpush1.bf16.msra.mxu1 %v740_v52  ;;  %711 = vmatprep.subr.bf16.mxu0 %v710_v53  ;;  %v718_v14 = vpack.c.bf16 %v117_v9, %v113_v8  ;;  %v116_v16 = vld [vmem:[#allocation5 + $0x1a0] sm:$0xff]  ;;  %v114_v17 = vld [vmem:[#allocation5 + $0x190] sm:$0xff]  ;;  %v750_v18 = vpack.c.bf16 %v119_v11, %v115_v10  ;;  %v121_v20 = vld [vmem:[#allocation5 + $0x1c8] sm:$0xff] }
  0x4a   :  { %743 = vmatprep.subr.bf16.mxu1 %v742_v57  ;;  %v118_v19 = vld [vmem:[#allocation5 + $0x1b0] sm:$0xff]  ;;  %v125_v21 = vld [vmem:[#allocation5 + $0x1e8] sm:$0xff]  ;;  %v123_v22 = vld [vmem:[#allocation5 + $0x1d8] sm:$0xff]  ;;  %v720_v24 = vpack.c.bf16 %v116_v16, %v112_v15 }
  0x4b   :  { %v127_v23 = vld [vmem:[#allocation5 + $0x1f8] sm:$0xff]  ;;  %v752_v25 = vpack.c.bf16 %v118_v19, %v114_v17  ;;  %v722_v26 = vpack.c.bf16 %v125_v21, %v121_v20  ;;  %v120_v27 = vld [vmem:[#allocation5 + $0x1c0] sm:$0xff]  ;;  %v122_v29 = vld [vmem:[#allocation5 + $0x1d0] sm:$0xff] }
  0x4c   :  { %713 = vmatpush1.bf16.msra.mxu0 %v712_v63  ;;  %v124_v28 = vld [vmem:[#allocation5 + $0x1e0] sm:$0xff]  ;;  %v754_v30 = vpack.c.bf16 %v127_v23, %v123_v22  ;;  %v126_v31 = vld [vmem:[#allocation5 + $0x1f0] sm:$0xff]  ;;  %v393_v33 = vld [vmem:[#allocation7 + $0x88] sm:$0xff] }
  0x4d   :  { %745 = vmatpush1.bf16.msra.mxu1 %v744_v1  ;;  %715 = vmatprep.subr.bf16.mxu0 %v714_v2  ;;  %v392_v32 = vld [vmem:[#allocation7 + $0x80] sm:$0xff]  ;;  %v425_v35 = vld [vmem:[#allocation7 + $0x188] sm:$0xff]  ;;  %v724_v36 = vpack.c.bf16 %v124_v28, %v120_v27  ;;  %v756_v37 = vpack.c.bf16 %v126_v31, %v122_v29  ;;  %v62_v44 = vld [vmem:[#allocation2] sm:$0xff] }
  0x4e   :  { %747 = vmatprep.subr.bf16.mxu1 %v746_v6  ;;  %v424_v34 = vld [vmem:[#allocation7 + $0x180] sm:$0xff]  ;;  %v758_v38 = vpack.c.bf16 %v393_v33, %v392_v32  ;;  %v377_v41 = vld [vmem:[#allocation7 + $0x8] sm:$0xff]  ;;  %v63_v47 = vld [vmem:[#allocation2 + $0x8] sm:$0xff] }
  0x4f   :  { %v790_v39 = vpack.c.bf16 %v425_v35, %v424_v34  ;;  %v376_v40 = vld [vmem:[#allocation7] sm:$0xff]  ;;  %v409_v43 = vld [vmem:[#allocation7 + $0x108] sm:$0xff]  ;;  %v394_v48 = vld [vmem:[#allocation7 + $0x90] sm:$0xff] }
  0x50   :  { %717 = vmatpush1.bf16.msra.mxu0 %v716_v12  ;;  %v408_v42 = vld [vmem:[#allocation7 + $0x100] sm:$0xff]  ;;  %v760_v45 = vpack.c.bf16 %v377_v41, %v376_v40  ;;  %v395_v49 = vld [vmem:[#allocation7 + $0x98] sm:$0xff]  ;;  %v426_v50 = vld [vmem:[#allocation7 + $0x190] sm:$0xff] }
  0x51   :  { %749 = vmatpush1.bf16.msra.mxu1 %v748_v13  ;;  %719 = vmatprep.subr.bf16.mxu0 %v718_v14  ;;  %v792_v46 = vpack.c.bf16 %v409_v43, %v408_v42  ;;  %v762_v51 = vpack.c.bf16 %v395_v49, %v394_v48  ;;  %v427_v52 = vld [vmem:[#allocation7 + $0x198] sm:$0xff]  ;;  %v378_v54 = vld [vmem:[#allocation7 + $0x10] sm:$0xff]  ;;  %v397_v60 = vld [vmem:[#allocation7 + $0xa8] sm:$0xff] }
  0x52   :  { %751 = vmatprep.subr.bf16.mxu1 %v750_v18  ;;  %v794_v53 = vpack.c.bf16 %v427_v52, %v426_v50  ;;  %v379_v55 = vld [vmem:[#allocation7 + $0x18] sm:$0xff]  ;;  %v410_v56 = vld [vmem:[#allocation7 + $0x110] sm:$0xff]  ;;  %v428_v61 = vld [vmem:[#allocation7 + $0x1a0] sm:$0xff] }
  0x53   :  { %v764_v57 = vpack.c.bf16 %v379_v55, %v378_v54  ;;  %v411_v58 = vld [vmem:[#allocation7 + $0x118] sm:$0xff]  ;;  %v429_v63 = vld [vmem:[#allocation7 + $0x1a8] sm:$0xff]  ;;  %v380_v2 = vld [vmem:[#allocation7 + $0x20] sm:$0xff] }
  0x54   :  { %721 = vmatpush1.bf16.msra.mxu0 %v720_v24  ;;  %v796_v59 = vpack.c.bf16 %v411_v58, %v410_v56  ;;  %v798_v1 = vpack.c.bf16 %v429_v63, %v428_v61  ;;  %v381_v3 = vld [vmem:[#allocation7 + $0x28] sm:$0xff]  ;;  %v412_v4 = vld [vmem:[#allocation7 + $0x120] sm:$0xff]  ;;  %v398_v8 = vld [vmem:[#allocation7 + $0xb0] sm:$0xff] }
  0x55   :  { %753 = vmatpush1.bf16.msra.mxu1 %v752_v25  ;;  %723 = vmatprep.subr.bf16.mxu0 %v722_v26  ;;  %v768_v5 = vpack.c.bf16 %v381_v3, %v380_v2  ;;  %v413_v6 = vld [vmem:[#allocation7 + $0x128] sm:$0xff]  ;;  %v399_v9 = vld [vmem:[#allocation7 + $0xb8] sm:$0xff]  ;;  %v430_v10 = vld [vmem:[#allocation7 + $0x1b0] sm:$0xff] }
  0x56   :  { %755 = vmatprep.subr.bf16.mxu1 %v754_v30  ;;  %v800_v7 = vpack.c.bf16 %v413_v6, %v412_v4  ;;  %v770_v11 = vpack.c.bf16 %v399_v9, %v398_v8  ;;  %v431_v12 = vld [vmem:[#allocation7 + $0x1b8] sm:$0xff]  ;;  %v382_v13 = vld [vmem:[#allocation7 + $0x30] sm:$0xff]  ;;  %v400_v20 = vld [vmem:[#allocation7 + $0xc0] sm:$0xff]  ;;  %v130_v4 = vlaneseq }
  0x57   :  { %v383_v14 = vld [vmem:[#allocation7 + $0x38] sm:$0xff]  ;;  %v802_v15 = vpack.c.bf16 %v431_v12, %v430_v10  ;;  %v414_v17 = vld [vmem:[#allocation7 + $0x130] sm:$0xff]  ;;  %v401_v21 = vld [vmem:[#allocation7 + $0xc8] sm:$0xff] }
  0x58   :  { %725 = vmatpush1.bf16.msra.mxu0 %v724_v36  ;;  %v772_v16 = vpack.c.bf16 %v383_v14, %v382_v13  ;;  %v415_v18 = vld [vmem:[#allocation7 + $0x138] sm:$0xff]  ;;  %v432_v22 = vld [vmem:[#allocation7 + $0x1c0] sm:$0xff]  ;;  %v774_v23 = vpack.c.bf16 %v401_v21, %v400_v20  ;;  %v433_v24 = vld [vmem:[#allocation7 + $0x1c8] sm:$0xff] }
  0x59   :  { %757 = vmatpush1.bf16.msra.mxu1 %v756_v37  ;;  %759 = vmatprep.subr.bf16.mxu0 %v758_v38  ;;  %v804_v19 = vpack.c.bf16 %v415_v18, %v414_v17  ;;  %v384_v25 = vld [vmem:[#allocation7 + $0x40] sm:$0xff]  ;;  %v385_v26 = vld [vmem:[#allocation7 + $0x48] sm:$0xff]  ;;  %v806_v27 = vpack.c.bf16 %v433_v24, %v432_v22  ;;  %v402_v32 = vld [vmem:[#allocation7 + $0xd0] sm:$0xff] }
  0x5a   :  { %791 = vmatprep.subr.bf16.mxu1 %v790_v39  ;;  %v776_v28 = vpack.c.bf16 %v385_v26, %v384_v25  ;;  %v416_v29 = vld [vmem:[#allocation7 + $0x140] sm:$0xff]  ;;  %v417_v30 = vld [vmem:[#allocation7 + $0x148] sm:$0xff]  ;;  %v403_v33 = vld [vmem:[#allocation7 + $0xd8] sm:$0xff] }
  0x5b   :  { %215 = vmatmul.mubr.f32.vlgmr.msra.gmra.mrb[0].mxu0 %v62_v44  ;;  %v808_v31 = vpack.c.bf16 %v417_v30, %v416_v29  ;;  %v434_v34 = vld [vmem:[#allocation7 + $0x1d0] sm:$0xff]  ;;  %v778_v35 = vpack.c.bf16 %v403_v33, %v402_v32  ;;  %v435_v36 = vld [vmem:[#allocation7 + $0x1d8] sm:$0xff]  ;;  %v437_v48 = vld [vmem:[#allocation7 + $0x1e8] sm:$0xff] }
  0x5c   :  { %292 = vmatmul.mubr.f32.vlgmr.msra.gmra.mrb[0].mxu1 %v62_v44  ;;  %220 = vmatprep.mubr.f32.mxu0 %v948_v0  ;;  %v386_v37 = vld [vmem:[#allocation7 + $0x50] sm:$0xff]  ;;  %v387_v38 = vld [vmem:[#allocation7 + $0x58] sm:$0xff]  ;;  %v810_v39 = vpack.c.bf16 %v435_v36, %v434_v34  ;;  %v404_v44 = vld [vmem:[#allocation7 + $0xe0] sm:$0xff] }
  0x5d   :  { %297 = vmatprep.mubr.f32.mxu1 %v948_v0  ;;  %761 = vmatpush3.bf16.msra.mxu0 %v760_v45  ;;  %v396_v0 = vld [vmem:[#allocation7 + $0xa0] sm:$0xff]  ;;  %v780_v40 = vpack.c.bf16 %v387_v38, %v386_v37  ;;  %v418_v41 = vld [vmem:[#allocation7 + $0x150] sm:$0xff]  ;;  %v419_v42 = vld [vmem:[#allocation7 + $0x158] sm:$0xff] }
  0x5e   :  { %793 = vmatpush3.bf16.msra.mxu1 %v792_v46  ;;  %763 = vmatprep.subr.bf16.mxu0 %v762_v51  ;;  %v766_v62 = vpack.c.bf16 %v397_v60, %v396_v0  ;;  %v812_v43 = vpack.c.bf16 %v419_v42, %v418_v41  ;;  %v405_v45 = vld [vmem:[#allocation7 + $0xe8] sm:$0xff]  ;;  %v436_v46 = vld [vmem:[#allocation7 + $0x1e0] sm:$0xff]  ;;  %v406_v55 = vld [vmem:[#allocation7 + $0xf0] sm:$0xff] }
  0x5f   :  { %221 = vmatmul.mubr.f32.gmra.mrb[2].mxu0 %v63_v47  ;;  %795 = vmatprep.subr.bf16.mxu1 %v794_v53  ;;  %v388_v49 = vld [vmem:[#allocation7 + $0x60] sm:$0xff]  ;;  %v389_v50 = vld [vmem:[#allocation7 + $0x68] sm:$0xff]  ;;  %v814_v51 = vpack.c.bf16 %v437_v48, %v436_v46  ;;  %v438_v58 = vld [vmem:[#allocation7 + $0x1f0] sm:$0xff] }
  0x60   :  { %298 = vmatmul.mubr.f32.gmra.mrb[2].mxu1 %v63_v47  ;;  %v782_v47 = vpack.c.bf16 %v405_v45, %v404_v44  ;;  %v784_v52 = vpack.c.bf16 %v389_v50, %v388_v49  ;;  %v420_v53 = vld [vmem:[#allocation7 + $0x160] sm:$0xff]  ;;  %v421_v54 = vld [vmem:[#allocation7 + $0x168] sm:$0xff]  ;;  %v390_v61 = vld [vmem:[#allocation7 + $0x70] sm:$0xff] }
  0x61   :  { %765 = vmatpush3.bf16.msra.mxu0 %v764_v57  ;;  %v816_v56 = vpack.c.bf16 %v421_v54, %v420_v53  ;;  %v407_v57 = vld [vmem:[#allocation7 + $0xf8] sm:$0xff]  ;;  %v422_v63 = vld [vmem:[#allocation7 + $0x170] sm:$0xff] }
  0x62   :  { %797 = vmatpush3.bf16.msra.mxu1 %v796_v59  ;;  %767 = vmatprep.subr.bf16.mxu0 %v766_v62  ;;  %v439_v59 = vld [vmem:[#allocation7 + $0x1f8] sm:$0xff]  ;;  %v786_v0 = vpack.c.bf16 %v407_v57, %v406_v55 }
  0x63   :  { %799 = vmatprep.subr.bf16.mxu1 %v798_v1  ;;  %v818_v60 = vpack.c.bf16 %v439_v59, %v438_v58  ;;  %v391_v62 = vld [vmem:[#allocation7 + $0x78] sm:$0xff] }
  0x64   :  { %v788_v1 = vpack.c.bf16 %v391_v62, %v390_v61  ;;  %v423_v2 = vld [vmem:[#allocation7 + $0x178] sm:$0xff] }
  0x65   :  { %769 = vmatpush3.bf16.msra.mxu0 %v768_v5  ;;  %v820_v3 = vpack.c.bf16 %v423_v2, %v422_v63  ;;  %v131_v5 = vshrl.u32 %v130_v4, 7 }
  0x66   :  { %801 = vmatpush3.bf16.msra.mxu1 %v800_v7  ;;  %771 = vmatprep.subr.bf16.mxu0 %v770_v11  ;;  %v128_v7 = vld [vmem:[%s1085_s2] sm:$0xf] }
  0x67   :  { %803 = vmatprep.subr.bf16.mxu1 %v802_v15  ;;  %v132_v6 = vsub.s32 0, %v131_v5  ;;  %v140_v8 = vsub.s32 2, %v131_v5  ;;  %v136_v9 = vsub.s32 1, %v131_v5  ;;  %v144_v10 = vsub.s32 3, %v131_v5 }
  0x69   :  { %773 = vmatpush3.bf16.msra.mxu0 %v772_v16  ;;  %v133_v11 = vrot.slane %v128_v7, %v132_v6  ;;  %v141_v12 = vrot.slane %v128_v7, %v140_v8  ;;  %v137_v13 = vrot.slane %v128_v7, %v136_v9  ;;  %v145_v14 = vrot.slane %v128_v7, %v144_v10 }
  0x6a   :  { %805 = vmatpush3.bf16.msra.mxu1 %v804_v19  ;;  %775 = vmatprep.subr.bf16.mxu0 %v774_v23 }
  0x6b   :  { %807 = vmatprep.subr.bf16.mxu1 %v806_v27 }
  0x6d   :  { %777 = vmatpush3.bf16.msra.mxu0 %v776_v28 }
  0x6e   :  { %809 = vmatpush3.bf16.msra.mxu1 %v808_v31  ;;  %779 = vmatprep.subr.bf16.mxu0 %v778_v35 }
  0x6f   :  { %811 = vmatprep.subr.bf16.mxu1 %v810_v39 }
  0x71   :  { %781 = vmatpush3.bf16.msra.mxu0 %v780_v40 }
  0x72   :  { %813 = vmatpush3.bf16.msra.mxu1 %v812_v43  ;;  %783 = vmatprep.subr.bf16.mxu0 %v782_v47 }
  0x73   :  { %815 = vmatprep.subr.bf16.mxu1 %v814_v51 }
  0x75   :  { %785 = vmatpush3.bf16.msra.mxu0 %v784_v52 }
  0x76   :  { %817 = vmatpush3.bf16.msra.mxu1 %v816_v56  ;;  %787 = vmatprep.subr.bf16.mxu0 %v786_v0 }
  0x77   :  { %819 = vmatprep.subr.bf16.mxu1 %v818_v60 }
  0x79   :  { %789 = vmatpush3.bf16.msra.mxu0 %v788_v1 }
  0x7a   :  { %821 = vmatpush3.bf16.msra.mxu1 %v820_v3 }
 0x12e   :  { %v216_v15 = vpop.f32.mrb[0].mxu0 }
 0x12f   :  { %v1029_v16 = vadd.f32 %v216_v15, %v133_v11  ;;  %v293_v17 = vpop.f32.mrb[0].mxu1  ;;  %v218_v18 = vpop.f32.mrb[1].mxu0 }
 0x130   :  { %v1031_v19 = vadd.f32 %v293_v17, %v141_v12  ;;  %v1033_v20 = vadd.f32 %v218_v18, %v137_v13  ;;  %v295_v21 = vpop.f32.mrb[1].mxu1 }
 0x131   :  { %v304_v22 = vmul.f32 %v1029_v16, %v1029_v16  ;;  %v1037_v23 = vadd.f32 %v295_v21, %v145_v14  ;;  %v312_v27 = vmul.f32 0.7978846, %v1029_v16  ;;  %v344_v15 = vmul.f32 0.5, %v1029_v16 }
 0x132   :  { %v306_v24 = vmul.f32 %v1031_v19, %v1031_v19  ;;  %v305_v25 = vmul.f32 %v1033_v20, %v1033_v20  ;;  %v222_v26 = vpop.f32.mrb[2].mxu0  ;;  %v314_v31 = vmul.f32 0.7978846, %v1031_v19  ;;  %v313_v41 = vmul.f32 0.7978846, %v1033_v20 }
 0x133   :  { %v320_v28 = vmul.f32 0.044715, %v304_v22  ;;  %v307_v29 = vmul.f32 %v1037_v23, %v1037_v23  ;;  %v299_v30 = vpop.f32.mrb[2].mxu1  ;;  %v1047_v34 = vadd.f32 %v222_v26, %v133_v11  ;;  %v224_v38 = vpop.f32.mrb[3].mxu0  ;;  %v315_v45 = vmul.f32 0.7978846, %v1037_v23 }
 0x134   :  { %v322_v32 = vmul.f32 0.044715, %v306_v24  ;;  %v321_v33 = vmul.f32 0.044715, %v305_v25  ;;  %v1049_v37 = vadd.f32 %v299_v30, %v141_v12  ;;  %v301_v39 = vpop.f32.mrb[3].mxu1  ;;  %v225_v54 = vadd.f32 %v224_v38, %v137_v13 }
 0x135   :  { %v328_v35 = vadd.f32 1.0, %v320_v28  ;;  %v323_v36 = vmul.f32 0.044715, %v307_v29  ;;  %v308_v43 = vmul.f32 %v1047_v34, %v1047_v34  ;;  %v302_v55 = vadd.f32 %v301_v39, %v145_v14 }
 0x136   :  { %v330_v40 = vadd.f32 1.0, %v322_v32  ;;  %v329_v42 = vadd.f32 1.0, %v321_v33  ;;  %v310_v47 = vmul.f32 %v1049_v37, %v1049_v37  ;;  %v316_v56 = vmul.f32 0.7978846, %v1047_v34 }
 0x137   :  { %v336_v44 = vmul.f32 %v328_v35, %v312_v27  ;;  %v331_v46 = vadd.f32 1.0, %v323_v36  ;;  %v324_v50 = vmul.f32 0.044715, %v308_v43  ;;  %v318_v58 = vmul.f32 0.7978846, %v1049_v37 }
 0x138   :  { %v338_v48 = vmul.f32 %v330_v40, %v314_v31  ;;  %v337_v49 = vmul.f32 %v329_v42, %v313_v41  ;;  %v326_v52 = vmul.f32 0.044715, %v310_v47  ;;  %v309_v59 = vmul.f32 %v225_v54, %v225_v54  ;;  %v617_v43 = vld [vmem:[%s1087_s4] ss:$0 sm:$0xff]  ;;  %s913_s4 = scalar_lea.vmem %s605_s9, 256 }
 0x139   :  { %831 = vtanh.f32 %v336_v44  ;;  %v339_v51 = vmul.f32 %v331_v46, %v315_v45  ;;  %v332_v53 = vadd.f32 1.0, %v324_v50  ;;  %v311_v60 = vmul.f32 %v302_v55, %v302_v55  ;;  %p914_p10 = scmp.ne.s32.totalorder %s605_s9, %s913_s4  ;;  %p919_p12 = scmp.lt.s32.totalorder %s913_s4, %s913_s4 }
 0x13a   :  { %833 = vtanh.f32 %v338_v48  ;;  %v334_v57 = vadd.f32 1.0, %v326_v52  ;;  %v325_v62 = vmul.f32 0.044715, %v309_v59  ;;  %v317_v1 = vmul.f32 0.7978846, %v225_v54 }
 0x13b   :  { %835 = vtanh.f32 %v337_v49  ;;  %v340_v0 = vmul.f32 %v332_v53, %v316_v56  ;;  %v327_v63 = vmul.f32 0.044715, %v311_v60  ;;  %v319_v3 = vmul.f32 0.7978846, %v302_v55  ;;  %p920_p13 = por %p919_p12, %p918_p11 }
 0x13c   :  { %837 = vtanh.f32 %v339_v51  ;;  %v342_v61 = vmul.f32 %v334_v57, %v318_v58  ;;  %v333_v2 = vadd.f32 1.0, %v325_v62  ;;  %v345_v13 = vmul.f32 0.5, %v1033_v20 }
 0x13d   :  { %839 = vtanh.f32 %v340_v0  ;;  %v335_v4 = vadd.f32 1.0, %v327_v63  ;;  %v347_v17 = vmul.f32 0.5, %v1037_v23  ;;  %v346_v21 = vmul.f32 0.5, %v1031_v19  ;;  %p921_p0 = pnand %p920_p13, %p914_p10 }
 0x13e   :  { %841 = vtanh.f32 %v342_v61  ;;  %v341_v5 = vmul.f32 %v333_v2, %v317_v1  ;;  %v349_v31 = vmul.f32 0.5, %v225_v54  ;;  %v348_v23 = vmul.f32 0.5, %v1047_v34 }
 0x13f   :  { %v343_v7 = vmul.f32 %v335_v4, %v319_v3  ;;  %v351_v33 = vmul.f32 0.5, %v302_v55  ;;  %v350_v35 = vmul.f32 0.5, %v1049_v37 }
 0x140   :  { %843 = vtanh.f32 %v341_v5 }
 0x141   :  { %845 = vtanh.f32 %v343_v7 }
 0x143   :  { %v832_v6 = vpop.eup %831 }
 0x144   :  { %v834_v8 = vpop.eup %833  ;;  %v360_v10 = vadd.f32 1.0, %v832_v6 }
 0x145   :  { %v836_v9 = vpop.eup %835  ;;  %v362_v12 = vadd.f32 1.0, %v834_v8 }
 0x146   :  { %v838_v11 = vpop.eup %837  ;;  %v361_v14 = vadd.f32 1.0, %v836_v9  ;;  %v368_v24 = vmul.f32 %v360_v10, %v344_v15 }
 0x147   :  { %v363_v18 = vadd.f32 1.0, %v838_v11  ;;  %v370_v26 = vmul.f32 %v362_v12, %v346_v21  ;;  %v840_v27 = vpop.eup %839 }
 0x148   :  { %v369_v22 = vmul.f32 %v361_v14, %v345_v13  ;;  %v842_v28 = vpop.eup %841  ;;  %v364_v20 = vadd.f32 1.0, %v840_v27 }
 0x149   :  { %v371_v25 = vmul.f32 %v363_v18, %v347_v17  ;;  %v366_v32 = vadd.f32 1.0, %v842_v28 }
 0x14a   :  { %511 = vmatprep.mubr.f32.mxu0 %v369_v22  ;;  %v844_v29 = vpop.eup %843  ;;  %v372_v39 = vmul.f32 %v364_v20, %v348_v23 }
 0x14b   :  { %586 = vmatprep.mubr.f32.mxu1 %v371_v25  ;;  %512 = vmatmul.mubr.f32.vlgmr.msra.gmra.mrb[4].mxu0 %v368_v24  ;;  %v846_v30 = vpop.eup %845  ;;  %v365_v16 = vadd.f32 1.0, %v844_v29  ;;  %v374_v40 = vmul.f32 %v366_v32, %v350_v35 }
 0x14c   :  { %587 = vmatmul.mubr.f32.vlgmr.msra.gmra.mrb[4].mxu1 %v370_v26  ;;  %v367_v19 = vadd.f32 1.0, %v846_v30 }
 0x14d   :  { %v373_v36 = vmul.f32 %v365_v16, %v349_v31 }
 0x14e   :  { %v375_v38 = vmul.f32 %v367_v19, %v351_v33 }
 0x14f   :  { %516 = vmatprep.mubr.f32.mxu0 %v373_v36 }
 0x150   :  { %591 = vmatprep.mubr.f32.mxu1 %v375_v38  ;;  %517 = vmatmul.mubr.f32.gmra.mrb[6].mxu0 %v372_v39 }
 0x151   :  { %592 = vmatmul.mubr.f32.gmra.mrb[6].mxu1 %v374_v40 }
 0x21e   :  { %v650_v41 = vpop.f32.mrb[4].mxu0 }
 0x21f   :  { %v688_v42 = vpop.f32.mrb[4].mxu1  ;;  %v651_v44 = vpop.f32.mrb[5].mxu0 }
 0x220   :  { %v652_v34 = vadd.f32 %v651_v44, %v650_v41  ;;  %v689_v45 = vpop.f32.mrb[5].mxu1 }
 0x221   :  { %v690_v46 = vadd.f32 %v689_v45, %v688_v42 }
 0x222   :  { %v514_v47 = vadd.f32 %v652_v34, %v617_v43 }
 0x223   :  { %v653_v48 = vpop.f32.mrb[6].mxu0 }
 0x224   :  { %v589_v37 = vadd.f32 %v690_v46, %v514_v47  ;;  %v691_v49 = vpop.f32.mrb[6].mxu1  ;;  %v654_v50 = vpop.f32.mrb[7].mxu0 }
 0x225   :  { %v655_v51 = vadd.f32 %v654_v50, %v653_v48  ;;  %v692_v52 = vpop.f32.mrb[7].mxu1 }
 0x226   :  { %597 = vst [vmem:[#allocation8] sm:$0xff] %v589_v37  ;;  %v693_v53 = vadd.f32 %v692_v52, %v691_v49 }
 0x227   :  { %v519_v54 = vadd.f32 %v655_v51, %v617_v43 }
 0x229   :  { %v594_v55 = vadd.f32 %v693_v53, %v519_v54 }
 0x22b   :  { %598 = vst [vmem:[#allocation8 + $0x8] sm:$0xff] %v594_v55 }
 0x22c   :  { %924 = shalt.err (!%p921_p0)
}
 0x22d   :  { %s925_s12 = scalar_lea.hbm %s1088_s5, 256 }
 0x22e   :  { %p926_p1 = scmp.ne.s32.totalorder %s1088_s5, %s925_s12  ;;  %p929_p2 = scmp.lt.u32.totalorder %s925_s12, %s1088_s5 }
 0x230   :  { %p931_p3 = pnand %p929_p2, %p926_p1 }
 0x232   :  { %934 = shalt.err (!%p931_p3)
}
 0x233   :  { %610 = dma.vmem_to_hbm [thread:$0]  %s605_s9, 256, %s1088_s5, [#allocation4], %s945_s1, %s945_s1, %s946_s17  }
 0x234   :  { %939 = dma.done.wait [#allocation4], 256  }
 0x235   :  { %940 = vsyncadd [#allocation4], 4294967040 }
 0x236   :  { %614 = vsyncpa [#allocation3], 1 }
 0x237   :  { %615 = vsyncpa [#allocation6], 1 }
 0x238   :  { %616 = vsyncpa [#allocation4], 1 }

</bundles_post_ra>
